<compile_context>
chip_gen: v7x
topology: tpu7x:2x2x1
jax: 0.10.0
libtpu: 0.0.40
codegen_flags: <defaults>
</compile_context>

<pallas_src>
import functools

import jax
import jax.numpy as jnp
from jax.experimental import pallas as pl
from jax.experimental.pallas import tpu as pltpu

NEG_SLOPE = 0.01   # nn.LeakyReLU default
BN_EPS = 1e-5      # nn.BatchNorm2d default
VMEM_LIMIT = 32 * 1024 * 1024


def _round_up(x, m):
    return ((x + m - 1) // m) * m


def _choose_m_tile(m, cap=1024):
    """Largest multiple-of-128 divisor of m that is <= cap (else the full extent)."""
    if m <= cap or m % 128 != 0:
        return m
    t = cap - (cap % 128)
    while t >= 128:
        if m % t == 0:
            return t
        t -= 128
    return m


# --------------------------------------------------------------------------------------
# ConvBlock kernel: single matmul (K = 9*Cin) + bias + LeakyReLU + BN affine + MaxPool[1,2]
# Output layout is transposed/lane-dense: (Cout, M_tile) with M on lanes.
# --------------------------------------------------------------------------------------
def conv_block_kernel(xt_ref, w_ref, b_ref, scale_ref, shift_ref, o_ref):
    w = w_ref[...]                                                     # (Cout, 9*Cin) bf16
    # One MXU matmul per parity half of the MaxPool window (f32 accumulation).
    z_even = jnp.dot(w, xt_ref[0], preferred_element_type=jnp.float32)  # (Cout, T)
    z_odd = jnp.dot(w, xt_ref[1], preferred_element_type=jnp.float32)   # (Cout, T)

    def post(z):
        z = z + b_ref[...]                       # conv bias, (Cout, 1) broadcast on lanes
        z = jnp.where(z >= 0, z, NEG_SLOPE * z)  # LeakyReLU
        return z * scale_ref[...] + shift_ref[...]   # BatchNorm (eval, folded)

    # MaxPool2d([1, 2]): max over the (even-w, odd-w) pair.
    o_ref[...] = jnp.maximum(post(z_even), post(z_odd)).astype(o_ref.dtype)


def conv_block_forward(x_cf, p, tile_cap=1024):
    """One ConvBlock in channels-first layout.

    x_cf: (Cin, N, H, W) float32 -> (Cout, N, H, W//2) float32.
    """
    Cin, N, H, W = x_cf.shape
    Cout = p["w"].shape[0]
    assert W % 2 == 0
    Wh = W // 2
    Mh = N * H * Wh                       # number of pooled output pixels
    K9 = 9 * Cin

    # Tap gather: build X^T with the 9 taps folded into K and an even/odd parity axis
    # for the fused MaxPool.  Rows ordered (dy, dx, cin); columns ordered (n, h, w_half).
    xpad = jnp.pad(x_cf, ((0, 0), (0, 0), (1, 1), (1, 1)))
    rows_e, rows_o = [], []
    for dy in range(3):
        for dx in range(3):
            patch = xpad[:, :, dy:dy + H, dx:dx + W]                    # (Cin, N, H, W)
            rows_e.append(patch[:, :, :, 0::2].reshape(Cin, Mh))
            rows_o.append(patch[:, :, :, 1::2].reshape(Cin, Mh))
    xt = jnp.stack([jnp.concatenate(rows_e, axis=0),
                    jnp.concatenate(rows_o, axis=0)], axis=0)           # (2, 9*Cin, Mh)
    xt = xt.astype(jnp.bfloat16)                                        # halve DMA bytes

    # torch conv weight (Cout, Cin, 3, 3) -> (Cout, 9*Cin) in (dy, dx, cin) order.
    w2 = jnp.transpose(p["w"], (0, 2, 3, 1)).reshape(Cout, K9).astype(jnp.bfloat16)

    scale = (p["gamma"] / jnp.sqrt(p["var"] + BN_EPS)).reshape(Cout, 1)
    shift = (p["beta"] - p["mean"] * scale[:, 0]).reshape(Cout, 1)
    bias = p["b"].reshape(Cout, 1)

    tile = _choose_m_tile(Mh, tile_cap)
    grid = (Mh // tile,)

    out = pl.pallas_call(
        conv_block_kernel,
        out_shape=jax.ShapeDtypeStruct((Cout, Mh), jnp.float32),
        grid_spec=pltpu.PrefetchScalarGridSpec(
            num_scalar_prefetch=0,
            grid=grid,
            in_specs=[
                pl.BlockSpec((2, K9, tile), lambda i: (0, 0, i)),   # X^T tile (lane-dense)
                pl.BlockSpec((Cout, K9), lambda i: (0, 0)),         # weights
                pl.BlockSpec((Cout, 1), lambda i: (0, 0)),          # conv bias
                pl.BlockSpec((Cout, 1), lambda i: (0, 0)),          # BN scale
                pl.BlockSpec((Cout, 1), lambda i: (0, 0)),          # BN shift
            ],
            out_specs=pl.BlockSpec((Cout, tile), lambda i: (0, i)),
        ),
        compiler_params=pltpu.CompilerParams(
            dimension_semantics=("parallel",),     # shards M tiles across TCs (v7x)
            vmem_limit_bytes=VMEM_LIMIT,
        ),
    )(xt, w2, bias, scale, shift)

    return out.reshape(Cout, N, H, Wh)


# --------------------------------------------------------------------------------------
# pred_block kernel: GAP (as pooling-matrix matmul) + conv1x1 + Linear + log_softmax
# (GAP is commuted in front of the 1x1 conv — both are linear, so results are identical.)
# --------------------------------------------------------------------------------------
def pred_kernel(y_ref, pool_ref, w1_ref, b1_ref, w2_ref, b2_ref, o_ref):
    g = jnp.dot(pool_ref[...], y_ref[...], preferred_element_type=jnp.float32)      # (N, C)
    f = jnp.dot(g, w1_ref[...], preferred_element_type=jnp.float32) + b1_ref[...]   # (N, Fp)
    logits = jnp.dot(f, w2_ref[...], preferred_element_type=jnp.float32) + b2_ref[...]
    m = jnp.max(logits, axis=-1, keepdims=True)
    s = logits - m
    lse = jnp.log(jnp.sum(jnp.exp(s), axis=-1, keepdims=True))
    o_ref[...] = (s - lse).astype(o_ref.dtype)                                       # log_softmax


def pred_block_forward(y_cf, p):
    """y_cf: (C, N, H, W) -> (N, num_out) log-probabilities."""
    C, N, H, W = y_cf.shape
    M = N * H * W
    hw = H * W
    F = p["w1x1"].shape[0]
    num_out = p["fc_w"].shape[0]
    Fp = _round_up(F, 128)          # 300 -> 384 (zero-padded)
    Op = _round_up(num_out, 128)    # 30 -> 128  (bias padded with -1e30, sliced off below)

    y2d = jnp.transpose(y_cf.reshape(C, M))                                   # (M, C)
    pool = jnp.repeat(jnp.eye(N, dtype=jnp.float32), hw, axis=1) / float(hw)  # (N, M) GAP

    w1 = jnp.zeros((C, Fp), jnp.float32).at[:, :F].set(
        jnp.transpose(p["w1x1"].reshape(F, C)))
    b1 = jnp.zeros((1, Fp), jnp.float32).at[:, :F].set(p["b1x1"].reshape(1, F))
    w2 = jnp.zeros((Fp, Op), jnp.float32).at[:F, :num_out].set(jnp.transpose(p["fc_w"]))
    b2 = jnp.full((1, Op), -1e30, jnp.float32).at[:, :num_out].set(
        p["fc_b"].reshape(1, num_out))

    out = pl.pallas_call(
        pred_kernel,
        out_shape=jax.ShapeDtypeStruct((N, Op), jnp.float32),
        grid_spec=pltpu.PrefetchScalarGridSpec(
            num_scalar_prefetch=0,
            grid=(1,),
            in_specs=[
                pl.BlockSpec((M, C), lambda i: (0, 0)),
                pl.BlockSpec((N, M), lambda i: (0, 0)),
                pl.BlockSpec((C, Fp), lambda i: (0, 0)),
                pl.BlockSpec((1, Fp), lambda i: (0, 0)),
                pl.BlockSpec((Fp, Op), lambda i: (0, 0)),
                pl.BlockSpec((1, Op), lambda i: (0, 0)),
            ],
            out_specs=pl.BlockSpec((N, Op), lambda i: (0, 0)),
        ),
        compiler_params=pltpu.CompilerParams(vmem_limit_bytes=VMEM_LIMIT),
    )(y2d, pool, w1, b1, w2, b2)

    return out[:, :num_out]


# --------------------------------------------------------------------------------------
# Block forward (NCHW in / NCHW out, channels-first internally)
# --------------------------------------------------------------------------------------
def block_forward(params, x_nchw, output_prob=False):
    x_cf = jnp.transpose(x_nchw, (1, 0, 2, 3))        # NCHW -> (C, N, H, W)
    y = conv_block_forward(x_cf, params["cb1"])
    y = conv_block_forward(y, params["cb2"])
    if output_prob:
        return pred_block_forward(y, params["pred"])
    return jnp.transpose(y, (1, 0, 2, 3))             # (C, N, H, W) -> NCHW


# --------------------------------------------------------------------------------------
# Deterministic parameter init (synthetic, matches module shapes)
# --------------------------------------------------------------------------------------
def init_params(key, in_channels, out_channels, num_predict_features=300, num_out=30):
    inter = (in_channels + out_channels) // 2

    def conv_block_params(k, cin, cout):
        ks = jax.random.split(k, 6)
        return dict(
            w=0.1 * jax.random.normal(ks[0], (cout, cin, 3, 3), jnp.float32),
            b=0.1 * jax.random.normal(ks[1], (cout,), jnp.float32),
            gamma=1.0 + 0.1 * jax.random.normal(ks[2], (cout,), jnp.float32),
            beta=0.1 * jax.random.normal(ks[3], (cout,), jnp.float32),
            mean=0.1 * jax.random.normal(ks[4], (cout,), jnp.float32),
            var=0.5 + jax.random.uniform(ks[5], (cout,), jnp.float32),
        )

    k1, k2, k3, k4, k5, k6 = jax.random.split(key, 6)
    return dict(
        cb1=conv_block_params(k1, in_channels, inter),
        cb2=conv_block_params(k2, inter, out_channels),
        pred=dict(
            w1x1=0.1 * jax.random.normal(k3, (num_predict_features, out_channels, 1, 1), jnp.float32),
            b1x1=0.1 * jax.random.normal(k4, (num_predict_features,), jnp.float32),
            fc_w=0.1 * jax.random.normal(k5, (num_out, num_predict_features), jnp.float32),
            fc_b=0.1 * jax.random.normal(k6, (num_out,), jnp.float32),
        ),
    )


# --------------------------------------------------------------------------------------
# Pure-JAX reference (eval-mode semantics, f32) for a sanity check
# --------------------------------------------------------------------------------------
def ref_conv_block(x_nchw, p):
    y = jax.lax.conv_general_dilated(
        x_nchw, p["w"], window_strides=(1, 1), padding=((1, 1), (1, 1)),
        dimension_numbers=("NCHW", "OIHW", "NCHW"),
        precision=jax.lax.Precision.HIGHEST)
    y = y + p["b"].reshape(1, -1, 1, 1)
    y = jnp.where(y >= 0, y, NEG_SLOPE * y)
    scale = (p["gamma"] / jnp.sqrt(p["var"] + BN_EPS)).reshape(1, -1, 1, 1)
    y = (y - p["mean"].reshape(1, -1, 1, 1)) * scale + p["beta"].reshape(1, -1, 1, 1)
    N, C, H, W = y.shape
    return y.reshape(N, C, H, W // 2, 2).max(axis=-1)


def ref_block(params, x_nchw, output_prob=False):
    y = ref_conv_block(x_nchw, params["cb1"])
    y = ref_conv_block(y, params["cb2"])
    if not output_prob:
        return y
    p = params["pred"]
    F, C = p["w1x1"].shape[0], p["w1x1"].shape[1]
    z = jnp.einsum("nchw,oc->nohw", y, p["w1x1"].reshape(F, C),
                   precision=jax.lax.Precision.HIGHEST) + p["b1x1"].reshape(1, -1, 1, 1)
    g = z.mean(axis=(2, 3))
    logits = g @ p["fc_w"].T + p["fc_b"]
    return jax.nn.log_softmax(logits, axis=1)


if __name__ == "__main__":
    key = jax.random.PRNGKey(0)
    kx, kp = jax.random.split(key)

    N, IN_C, OUT_C, H, W = 2, 4, 8, 16, 16
    x = jax.random.normal(kx, (N, IN_C, H, W), jnp.float32)
    params = init_params(kp, IN_C, OUT_C)

    fwd = jax.jit(block_forward, static_argnames=("output_prob",))

    # default forward (output_prob=False): two ConvBlocks -> (N, OUT_C, H, W//4)
    y = jax.block_until_ready(fwd(params, x, output_prob=False))

    # pred head path (output_prob=True): (N, 30) log-probabilities
    yp = jax.block_until_ready(fwd(params, x, output_prob=True))

    # sanity check against pure-JAX f32 reference (kernel uses bf16 MXU inputs with
    # f32 accumulation, so a slightly looser 2e-2 tolerance is used).
    y_ref = ref_block(params, x, output_prob=False)
    yp_ref = ref_block(params, x, output_prob=True)
    assert y.shape == (N, OUT_C, H, W // 4), y.shape
    assert yp.shape == (N, 30), yp.shape
    assert jnp.allclose(y, y_ref, rtol=2e-2, atol=2e-2), float(jnp.max(jnp.abs(y - y_ref)))
    assert jnp.allclose(yp, yp_ref, rtol=2e-2, atol=2e-2), float(jnp.max(jnp.abs(yp - yp_ref)))

    print("KERNEL_OK")
</pallas_src>

<mosaic_0001>
module attributes {stable_mosaic.version = 11 : i64} {
  func.func @conv_block_kernel(%arg0: i32, %arg1: memref<2x36x256xbf16, #tpu.memory_space<vmem>>, %arg2: memref<6x36xbf16, #tpu.memory_space<vmem>>, %arg3: memref<6x1xf32, #tpu.memory_space<vmem>>, %arg4: memref<6x1xf32, #tpu.memory_space<vmem>>, %arg5: memref<6x1xf32, #tpu.memory_space<vmem>>, %arg6: memref<6x256xf32, #tpu.memory_space<vmem>>) attributes {dimension_semantics = [#tpu.dimension_semantics<parallel>], iteration_bounds = array<i64: 1>, scalar_prefetch = 0 : i64, scratch_operands = 0 : i64, tpu.core_type = #tpu.core_type<tc>, window_params = [{transform_indices = @transform_0, window_bounds = array<i64: 2, 36, 256>}, {pipeline_mode = #tpu.pipeline_mode<synchronous>, transform_indices = @transform_1, window_bounds = array<i64: 6, 36>}, {pipeline_mode = #tpu.pipeline_mode<synchronous>, transform_indices = @transform_2, window_bounds = array<i64: 6, 1>}, {pipeline_mode = #tpu.pipeline_mode<synchronous>, transform_indices = @transform_3, window_bounds = array<i64: 6, 1>}, {pipeline_mode = #tpu.pipeline_mode<synchronous>, transform_indices = @transform_4, window_bounds = array<i64: 6, 1>}, {transform_indices = @transform_5, window_bounds = array<i64: 6, 256>}]} {
    %c0 = arith.constant 0 : index
    %c0_0 = arith.constant 0 : index
    %0 = vector.load %arg2[%c0, %c0_0] : memref<6x36xbf16, #tpu.memory_space<vmem>>, vector<6x36xbf16>
    %c0_1 = arith.constant 0 : index
    %c0_2 = arith.constant 0 : index
    %c0_3 = arith.constant 0 : index
    %1 = vector.load %arg1[%c0_1, %c0_2, %c0_3] : memref<2x36x256xbf16, #tpu.memory_space<vmem>>, vector<1x36x256xbf16>
    %2 = vector.shape_cast %1 : vector<1x36x256xbf16> to vector<36x256xbf16>
    %cst = arith.constant dense<0.000000e+00> : vector<6x256xf32>
    %3 = tpu.matmul %0, %2, %cst {dimension_numbers = #tpu.dot_dimension_numbers<[1], [0], [0], [1], [0, 0, 1, 1], [], []>} : vector<6x36xbf16>, vector<36x256xbf16>, vector<6x256xf32> -> vector<6x256xf32>
    %c1 = arith.constant 1 : index
    %c0_4 = arith.constant 0 : index
    %c0_5 = arith.constant 0 : index
    %4 = vector.load %arg1[%c1, %c0_4, %c0_5] : memref<2x36x256xbf16, #tpu.memory_space<vmem>>, vector<1x36x256xbf16>
    %5 = vector.shape_cast %4 : vector<1x36x256xbf16> to vector<36x256xbf16>
    %cst_6 = arith.constant dense<0.000000e+00> : vector<6x256xf32>
    %6 = tpu.matmul %0, %5, %cst_6 {dimension_numbers = #tpu.dot_dimension_numbers<[1], [0], [0], [1], [0, 0, 1, 1], [], []>} : vector<6x36xbf16>, vector<36x256xbf16>, vector<6x256xf32> -> vector<6x256xf32>
    %c0_7 = arith.constant 0 : index
    %c0_8 = arith.constant 0 : index
    %7 = vector.load %arg3[%c0_7, %c0_8] : memref<6x1xf32, #tpu.memory_space<vmem>>, vector<6x1xf32>
    %8 = vector.broadcast %7 : vector<6x1xf32> to vector<6x256xf32>
    %9 = arith.addf %3, %8 : vector<6x256xf32>
    %cst_9 = arith.constant 0.000000e+00 : f32
    %10 = vector.broadcast %cst_9 : f32 to vector<6x256xf32>
    %11 = arith.cmpf oge, %9, %10 : vector<6x256xf32>
    %cst_10 = arith.constant 0.00999999977 : f32
    %12 = vector.broadcast %cst_10 : f32 to vector<6x256xf32>
    %13 = arith.mulf %12, %9 : vector<6x256xf32>
    %14 = arith.select %11, %9, %13 : vector<6x256xi1>, vector<6x256xf32>
    %c0_11 = arith.constant 0 : index
    %c0_12 = arith.constant 0 : index
    %15 = vector.load %arg4[%c0_11, %c0_12] : memref<6x1xf32, #tpu.memory_space<vmem>>, vector<6x1xf32>
    %16 = vector.broadcast %15 : vector<6x1xf32> to vector<6x256xf32>
    %17 = arith.mulf %14, %16 : vector<6x256xf32>
    %c0_13 = arith.constant 0 : index
    %c0_14 = arith.constant 0 : index
    %18 = vector.load %arg5[%c0_13, %c0_14] : memref<6x1xf32, #tpu.memory_space<vmem>>, vector<6x1xf32>
    %19 = vector.broadcast %18 : vector<6x1xf32> to vector<6x256xf32>
    %20 = arith.addf %17, %19 : vector<6x256xf32>
    %c0_15 = arith.constant 0 : index
    %c0_16 = arith.constant 0 : index
    %21 = vector.load %arg3[%c0_15, %c0_16] : memref<6x1xf32, #tpu.memory_space<vmem>>, vector<6x1xf32>
    %22 = vector.broadcast %21 : vector<6x1xf32> to vector<6x256xf32>
    %23 = arith.addf %6, %22 : vector<6x256xf32>
    %cst_17 = arith.constant 0.000000e+00 : f32
    %24 = vector.broadcast %cst_17 : f32 to vector<6x256xf32>
    %25 = arith.cmpf oge, %23, %24 : vector<6x256xf32>
    %cst_18 = arith.constant 0.00999999977 : f32
    %26 = vector.broadcast %cst_18 : f32 to vector<6x256xf32>
    %27 = arith.mulf %26, %23 : vector<6x256xf32>
    %28 = arith.select %25, %23, %27 : vector<6x256xi1>, vector<6x256xf32>
    %c0_19 = arith.constant 0 : index
    %c0_20 = arith.constant 0 : index
    %29 = vector.load %arg4[%c0_19, %c0_20] : memref<6x1xf32, #tpu.memory_space<vmem>>, vector<6x1xf32>
    %30 = vector.broadcast %29 : vector<6x1xf32> to vector<6x256xf32>
    %31 = arith.mulf %28, %30 : vector<6x256xf32>
    %c0_21 = arith.constant 0 : index
    %c0_22 = arith.constant 0 : index
    %32 = vector.load %arg5[%c0_21, %c0_22] : memref<6x1xf32, #tpu.memory_space<vmem>>, vector<6x1xf32>
    %33 = vector.broadcast %32 : vector<6x1xf32> to vector<6x256xf32>
    %34 = arith.addf %31, %33 : vector<6x256xf32>
    %35 = arith.maximumf %20, %34 : vector<6x256xf32>
    %c0_23 = arith.constant 0 : index
    %c0_24 = arith.constant 0 : index
    %36 = vector.load %arg6[%c0_23, %c0_24] : memref<6x256xf32, #tpu.memory_space<vmem>>, vector<6x256xf32>
    tpu.vector_store %arg6[%c0_23, %c0_24], %35 {strides = array<i32>} : memref<6x256xf32, #tpu.memory_space<vmem>>, vector<6x256xf32>,
    return
  }
  func.func @transform_0(%arg0: i32) -> (i32, i32, i32) {
    %c0_i32 = arith.constant 0 : i32
    %c0_i32_0 = arith.constant 0 : i32
    %c0_i32_1 = arith.constant 0 : i32
    return %c0_i32, %c0_i32_0, %arg0 : i32, i32, i32
  }
  func.func @transform_1(%arg0: i32) -> (i32, i32) {
    %c0_i32 = arith.constant 0 : i32
    %c0_i32_0 = arith.constant 0 : i32
    %c0_i32_1 = arith.constant 0 : i32
    return %c0_i32, %c0_i32_0 : i32, i32
  }
  func.func @transform_2(%arg0: i32) -> (i32, i32) {
    %c0_i32 = arith.constant 0 : i32
    %c0_i32_0 = arith.constant 0 : i32
    %c0_i32_1 = arith.constant 0 : i32
    return %c0_i32, %c0_i32_0 : i32, i32
  }
  func.func @transform_3(%arg0: i32) -> (i32, i32) {
    %c0_i32 = arith.constant 0 : i32
    %c0_i32_0 = arith.constant 0 : i32
    %c0_i32_1 = arith.constant 0 : i32
    return %c0_i32, %c0_i32_0 : i32, i32
  }
  func.func @transform_4(%arg0: i32) -> (i32, i32) {
    %c0_i32 = arith.constant 0 : i32
    %c0_i32_0 = arith.constant 0 : i32
    %c0_i32_1 = arith.constant 0 : i32
    return %c0_i32, %c0_i32_0 : i32, i32
  }
  func.func @transform_5(%arg0: i32) -> (i32, i32) {
    %c0_i32 = arith.constant 0 : i32
    %c0_i32_0 = arith.constant 0 : i32
    return %c0_i32, %arg0 : i32, i32
  }
}

module attributes {stable_mosaic.version = 11 : i64} {
  func.func @conv_block_kernel(%arg0: i32, %arg1: memref<2x54x128xbf16, #tpu.memory_space<vmem>>, %arg2: memref<8x54xbf16, #tpu.memory_space<vmem>>, %arg3: memref<8x1xf32, #tpu.memory_space<vmem>>, %arg4: memref<8x1xf32, #tpu.memory_space<vmem>>, %arg5: memref<8x1xf32, #tpu.memory_space<vmem>>, %arg6: memref<8x128xf32, #tpu.memory_space<vmem>>) attributes {dimension_semantics = [#tpu.dimension_semantics<parallel>], iteration_bounds = array<i64: 1>, scalar_prefetch = 0 : i64, scratch_operands = 0 : i64, tpu.core_type = #tpu.core_type<tc>, window_params = [{transform_indices = @transform_0, window_bounds = array<i64: 2, 54, 128>}, {pipeline_mode = #tpu.pipeline_mode<synchronous>, transform_indices = @transform_1, window_bounds = array<i64: 8, 54>}, {pipeline_mode = #tpu.pipeline_mode<synchronous>, transform_indices = @transform_2, window_bounds = array<i64: 8, 1>}, {pipeline_mode = #tpu.pipeline_mode<synchronous>, transform_indices = @transform_3, window_bounds = array<i64: 8, 1>}, {pipeline_mode = #tpu.pipeline_mode<synchronous>, transform_indices = @transform_4, window_bounds = array<i64: 8, 1>}, {transform_indices = @transform_5, window_bounds = array<i64: 8, 128>}]} {
    %c0 = arith.constant 0 : index
    %c0_0 = arith.constant 0 : index
    %0 = vector.load %arg2[%c0, %c0_0] : memref<8x54xbf16, #tpu.memory_space<vmem>>, vector<8x54xbf16>
    %c0_1 = arith.constant 0 : index
    %c0_2 = arith.constant 0 : index
    %c0_3 = arith.constant 0 : index
    %1 = vector.load %arg1[%c0_1, %c0_2, %c0_3] : memref<2x54x128xbf16, #tpu.memory_space<vmem>>, vector<1x54x128xbf16>
    %2 = vector.shape_cast %1 : vector<1x54x128xbf16> to vector<54x128xbf16>
    %cst = arith.constant dense<0.000000e+00> : vector<8x128xf32>
    %3 = tpu.matmul %0, %2, %cst {dimension_numbers = #tpu.dot_dimension_numbers<[1], [0], [0], [1], [0, 0, 1, 1], [], []>} : vector<8x54xbf16>, vector<54x128xbf16>, vector<8x128xf32> -> vector<8x128xf32>
    %c1 = arith.constant 1 : index
    %c0_4 = arith.constant 0 : index
    %c0_5 = arith.constant 0 : index
    %4 = vector.load %arg1[%c1, %c0_4, %c0_5] : memref<2x54x128xbf16, #tpu.memory_space<vmem>>, vector<1x54x128xbf16>
    %5 = vector.shape_cast %4 : vector<1x54x128xbf16> to vector<54x128xbf16>
    %cst_6 = arith.constant dense<0.000000e+00> : vector<8x128xf32>
    %6 = tpu.matmul %0, %5, %cst_6 {dimension_numbers = #tpu.dot_dimension_numbers<[1], [0], [0], [1], [0, 0, 1, 1], [], []>} : vector<8x54xbf16>, vector<54x128xbf16>, vector<8x128xf32> -> vector<8x128xf32>
    %c0_7 = arith.constant 0 : index
    %c0_8 = arith.constant 0 : index
    %7 = vector.load %arg3[%c0_7, %c0_8] : memref<8x1xf32, #tpu.memory_space<vmem>>, vector<8x1xf32>
    %8 = vector.broadcast %7 : vector<8x1xf32> to vector<8x128xf32>
    %9 = arith.addf %3, %8 : vector<8x128xf32>
    %cst_9 = arith.constant 0.000000e+00 : f32
    %10 = vector.broadcast %cst_9 : f32 to vector<8x128xf32>
    %11 = arith.cmpf oge, %9, %10 : vector<8x128xf32>
    %cst_10 = arith.constant 0.00999999977 : f32
    %12 = vector.broadcast %cst_10 : f32 to vector<8x128xf32>
    %13 = arith.mulf %12, %9 : vector<8x128xf32>
    %14 = arith.select %11, %9, %13 : vector<8x128xi1>, vector<8x128xf32>
    %c0_11 = arith.constant 0 : index
    %c0_12 = arith.constant 0 : index
    %15 = vector.load %arg4[%c0_11, %c0_12] : memref<8x1xf32, #tpu.memory_space<vmem>>, vector<8x1xf32>
    %16 = vector.broadcast %15 : vector<8x1xf32> to vector<8x128xf32>
    %17 = arith.mulf %14, %16 : vector<8x128xf32>
    %c0_13 = arith.constant 0 : index
    %c0_14 = arith.constant 0 : index
    %18 = vector.load %arg5[%c0_13, %c0_14] : memref<8x1xf32, #tpu.memory_space<vmem>>, vector<8x1xf32>
    %19 = vector.broadcast %18 : vector<8x1xf32> to vector<8x128xf32>
    %20 = arith.addf %17, %19 : vector<8x128xf32>
    %c0_15 = arith.constant 0 : index
    %c0_16 = arith.constant 0 : index
    %21 = vector.load %arg3[%c0_15, %c0_16] : memref<8x1xf32, #tpu.memory_space<vmem>>, vector<8x1xf32>
    %22 = vector.broadcast %21 : vector<8x1xf32> to vector<8x128xf32>
    %23 = arith.addf %6, %22 : vector<8x128xf32>
    %cst_17 = arith.constant 0.000000e+00 : f32
    %24 = vector.broadcast %cst_17 : f32 to vector<8x128xf32>
    %25 = arith.cmpf oge, %23, %24 : vector<8x128xf32>
    %cst_18 = arith.constant 0.00999999977 : f32
    %26 = vector.broadcast %cst_18 : f32 to vector<8x128xf32>
    %27 = arith.mulf %26, %23 : vector<8x128xf32>
    %28 = arith.select %25, %23, %27 : vector<8x128xi1>, vector<8x128xf32>
    %c0_19 = arith.constant 0 : index
    %c0_20 = arith.constant 0 : index
    %29 = vector.load %arg4[%c0_19, %c0_20] : memref<8x1xf32, #tpu.memory_space<vmem>>, vector<8x1xf32>
    %30 = vector.broadcast %29 : vector<8x1xf32> to vector<8x128xf32>
    %31 = arith.mulf %28, %30 : vector<8x128xf32>
    %c0_21 = arith.constant 0 : index
    %c0_22 = arith.constant 0 : index
    %32 = vector.load %arg5[%c0_21, %c0_22] : memref<8x1xf32, #tpu.memory_space<vmem>>, vector<8x1xf32>
    %33 = vector.broadcast %32 : vector<8x1xf32> to vector<8x128xf32>
    %34 = arith.addf %31, %33 : vector<8x128xf32>
    %35 = arith.maximumf %20, %34 : vector<8x128xf32>
    %c0_23 = arith.constant 0 : index
    %c0_24 = arith.constant 0 : index
    %36 = vector.load %arg6[%c0_23, %c0_24] : memref<8x128xf32, #tpu.memory_space<vmem>>, vector<8x128xf32>
    tpu.vector_store %arg6[%c0_23, %c0_24], %35 {strides = array<i32>} : memref<8x128xf32, #tpu.memory_space<vmem>>, vector<8x128xf32>,
    return
  }
  func.func @transform_0(%arg0: i32) -> (i32, i32, i32) {
    %c0_i32 = arith.constant 0 : i32
    %c0_i32_0 = arith.constant 0 : i32
    %c0_i32_1 = arith.constant 0 : i32
    return %c0_i32, %c0_i32_0, %arg0 : i32, i32, i32
  }
  func.func @transform_1(%arg0: i32) -> (i32, i32) {
    %c0_i32 = arith.constant 0 : i32
    %c0_i32_0 = arith.constant 0 : i32
    %c0_i32_1 = arith.constant 0 : i32
    return %c0_i32, %c0_i32_0 : i32, i32
  }
  func.func @transform_2(%arg0: i32) -> (i32, i32) {
    %c0_i32 = arith.constant 0 : i32
    %c0_i32_0 = arith.constant 0 : i32
    %c0_i32_1 = arith.constant 0 : i32
    return %c0_i32, %c0_i32_0 : i32, i32
  }
  func.func @transform_3(%arg0: i32) -> (i32, i32) {
    %c0_i32 = arith.constant 0 : i32
    %c0_i32_0 = arith.constant 0 : i32
    %c0_i32_1 = arith.constant 0 : i32
    return %c0_i32, %c0_i32_0 : i32, i32
  }
  func.func @transform_4(%arg0: i32) -> (i32, i32) {
    %c0_i32 = arith.constant 0 : i32
    %c0_i32_0 = arith.constant 0 : i32
    %c0_i32_1 = arith.constant 0 : i32
    return %c0_i32, %c0_i32_0 : i32, i32
  }
  func.func @transform_5(%arg0: i32) -> (i32, i32) {
    %c0_i32 = arith.constant 0 : i32
    %c0_i32_0 = arith.constant 0 : i32
    return %c0_i32, %arg0 : i32, i32
  }
}

</mosaic_0001>

<bundles_post_ra>
// kernel: block_forward.2
= control target key start
LH: loop header
LB: loop body
LE: loop exit
PB: predicated region body
PF: predicated region fallthrough
CT: control target
= control target key end

     0   :  { %v268_v1 = vmov 0   ;;  %vm68_vm0 = vcmask 1041408   ;;  %vm64_vm1 = vcmask 293888   ;;  %s351_s0 = inlined_call_operand.vmem [shape: bf16[2,36,256], index: 0, kind: input, shape index: {}]   ;;  %s352_s2 = inlined_call_operand.vmem [shape: f32[6,1], index: 2, kind: input, shape index: {}]   ;;  %s353_s4 = inlined_call_operand.vmem [shape: f32[6,1], index: 4, kind: input, shape index: {}]   ;;  %s354_s3 = inlined_call_operand.vmem [shape: f32[6,1], index: 3, kind: input, shape index: {}]   ;;  %s355_s1 = inlined_call_operand.vmem [shape: bf16[6,36], index: 1, kind: input, shape index: {}]   ;;  %s356_s5 = inlined_call_operand.vmem [shape: f32[6,256], index: 5, kind: output, shape index: {}]  }
   0x1   :  { %v252_v0 = vld [vmem:[%s351_s0 + $0x4] ss:$8 sps:$4 sm:$0xff]   ;;  %107 = vmatprep.mubr.bf16.mxu0 %v268_v1  ;;  %201 = vmatprep.mubr.bf16.mxu1 %v268_v1  ;;  %v256_v3 = vld [vmem:[%s351_s0] ss:$8 sps:$4 sm:$0xff]   ;;  %v258_v5 = vld [vmem:[%s351_s0 + $0x14] ss:$8 sps:$4 sm:$0xff]  }
   0x2   :  { %v254_v2 = vld [vmem:[%s351_s0 + $0x2c] ss:$8 sps:$4 sm:$0xff]   ;;  %250 = vset.pattern.permute.xlu0 %v268_v1  ;;  %251 = vset.pattern.permute.xlu1 %v268_v1  ;;  %v257_v4 = vld [vmem:[%s351_s0 + $0x28] ss:$8 sps:$4 sm:$0xff]   ;;  %v260_v6 = vld [vmem:[%s351_s0 + $0x3c] ss:$8 sps:$4 sm:$0xff]  }
   0x3   :  { %75 = vmatprep.subr.bf16.mxu0 %v252_v0  ;;  %169 = vmatprep.subr.bf16.mxu1 %v254_v2  ;;  %v262_v7 = vld [vmem:[%s351_s0 + $0x10] ss:$8 sps:$4 sm:$0xff]   ;;  %v26_v9 = vld [vmem:[%s351_s0 + $0x20] sm:$0x33]  ;;  %v232_v10 = vld [vmem:[%s351_s0 + $0x48] sm:$0x33] }
   0x4   :  { %76 = vmatpush1.bf16.msra.mxu0 %v256_v3  ;;  %170 = vmatpush1.bf16.msra.mxu1 %v257_v4  ;;  %v263_v8 = vld [vmem:[%s351_s0 + $0x38] ss:$8 sps:$4 sm:$0xff]   ;;  %v238_v11 = vcombine.high %v26_v9, %v26_v9  ;;  %v246_v12 = vcombine.high %v232_v10, %v232_v10  ;;  %v237_v13 = vcombine.low %v26_v9, %v26_v9 }
   0x5   :  { %77 = vmatprep.subr.bf16.mxu0 %v258_v5  ;;  %171 = vmatprep.subr.bf16.mxu1 %v260_v6  ;;  %v245_v14 = vcombine.low %v232_v10, %v232_v10  ;;  %v33_v15 = vld [vmem:[%s352_s2] sm:$0x3f] }
   0x6   :  { %36 = vperm.xlu0 %250, %v33_v15   ;;  %v130_v16 = vld [vmem:[%s353_s4] sm:$0x3f]  ;;  %v70_v18 = vsel %vm68_vm0, %v237_v13, 0 }
   0x7   :  { %v122_v17 = vld [vmem:[%s354_s3] sm:$0x3f]  ;;  %v164_v19 = vsel %vm68_vm0, %v245_v14, 0  ;;  %133 = vperm.xlu1 %251, %v130_v16  }
   0x8   :  { %78 = vmatpush1.bf16.msra.mxu0 %v262_v7  ;;  %172 = vmatpush1.bf16.msra.mxu1 %v263_v8  ;;  %v21_v20 = vld [vmem:[%s355_s1] sm:$0x7] }
   0x9   :  { %239 = vmatprep.subr.msk.bf16.mxu0 %vm68_vm0, %v238_v11  ;;  %247 = vmatprep.subr.msk.bf16.mxu1 %vm68_vm0, %v246_v12 }
   0xa   :  { %125 = vperm.xlu0 %250, %v122_v17  }
   0xc   :  { %80 = vmatpush1.bf16.msra.mxu0 %v70_v18  ;;  %174 = vmatpush1.bf16.msra.mxu1 %v164_v19 }
   0xf   :  { %240 = vmatmul.mubr.msk.bf16.vlgmr.msra.gmra.mrb[0].mxu0 %vm64_vm1, %v21_v20  ;;  %248 = vmatmul.mubr.msk.bf16.vlgmr.msra.gmra.mrb[0].mxu1 %vm64_vm1, %v21_v20 }
  0x85   :  { %v37_v21 = vpop.permute.xlu0 %36 }
  0x86   :  { %v134_v37 = vpop.permute.xlu1 %133 }
  0x89   :  { %v126_v34 = vpop.permute.xlu0 %125 }
  0xe2   :  { %v109_v22 = vpop.f32.mrb[0].mxu0  ;;  %v203_v23 = vpop.f32.mrb[0].mxu1 }
  0xe3   :  { %v110_v24 = vadd.f32 %v109_v22, %v37_v21  ;;  %v204_v25 = vadd.f32 %v203_v23, %v37_v21  ;;  %v111_v26 = vpop.f32.mrb[1].mxu0  ;;  %v205_v27 = vpop.f32.mrb[1].mxu1 }
  0xe4   :  { %v112_v28 = vadd.f32 %v111_v26, %v37_v21  ;;  %v206_v29 = vadd.f32 %v205_v27, %v37_v21  ;;  %v113_v30 = vpop.f32.mrb[2].mxu0  ;;  %v207_v31 = vpop.f32.mrb[2].mxu1 }
  0xe5   :  { %vm116_vm2 = vcmp.ge.f32.partialorder %v110_v24, 0.0  ;;  %v118_v32 = vmul.f32 0.01, %v110_v24  ;;  %vm210_vm3 = vcmp.ge.f32.partialorder %v204_v25, 0.0  ;;  %v212_v33 = vmul.f32 0.01, %v204_v25 }
  0xe6   :  { %vm117_vm4 = vcmp.ge.f32.partialorder %v112_v28, 0.0  ;;  %v119_v35 = vmul.f32 0.01, %v112_v28  ;;  %vm211_vm5 = vcmp.ge.f32.partialorder %v206_v29, 0.0  ;;  %v213_v36 = vmul.f32 0.01, %v206_v29 }
  0xe7   :  { %v120_v38 = vsel %vm116_vm2, %v110_v24, %v118_v32  ;;  %v214_v39 = vsel %vm210_vm3, %v204_v25, %v212_v33  ;;  %v114_v40 = vpop.f32.mrb[3].mxu0  ;;  %v208_v41 = vpop.f32.mrb[3].mxu1 }
  0xe8   :  { %v128_v42 = vmul.f32 %v126_v34, %v120_v38  ;;  %v216_v43 = vmul.f32 %v214_v39, %v126_v34  ;;  %v121_v44 = vsel %vm117_vm4, %v112_v28, %v119_v35  ;;  %v215_v45 = vsel %vm211_vm5, %v206_v29, %v213_v36 }
  0xe9   :  { %v129_v46 = vmul.f32 %v126_v34, %v121_v44  ;;  %v217_v47 = vmul.f32 %v215_v45, %v126_v34 }
  0xea   :  { %v136_v48 = vadd.f32 %v134_v37, %v128_v42  ;;  %v218_v49 = vadd.f32 %v216_v43, %v134_v37 }
  0xeb   :  { %v137_v50 = vadd.f32 %v134_v37, %v129_v46  ;;  %v219_v51 = vadd.f32 %v217_v47, %v134_v37 }
  0xec   :  { %v220_v52 = vmax.f32 %v136_v48, %v218_v49 }
  0xed   :  { %v221_v53 = vmax.f32 %v137_v50, %v219_v51 }
  0xee   :  { %222 = vst [vmem:[%s356_s5] sm:$0x3f] %v220_v52 }
  0xef   :  { %223 = vst [vmem:[%s356_s5 + $0x8] sm:$0x3f] %v221_v53 }

// kernel: block_forward.3
= control target key start
LH: loop header
LB: loop body
LE: loop exit
PB: predicated region body
PF: predicated region fallthrough
CT: control target
= control target key end

     0   :  { %v268_v0 = vmov 0.0   ;;  %vm269_vm0 = vmmov 0   ;;  %v270_v4 = vmov 0   ;;  %vm68_vm1 = vcmask 1042432   ;;  %s340_s0 = inlined_call_operand.vmem [shape: bf16[2,54,128], index: 0, kind: input, shape index: {}]   ;;  %s341_s2 = inlined_call_operand.vmem [shape: f32[8,1], index: 2, kind: input, shape index: {}]   ;;  %s342_s4 = inlined_call_operand.vmem [shape: f32[8,1], index: 4, kind: input, shape index: {}]   ;;  %s343_s3 = inlined_call_operand.vmem [shape: f32[8,1], index: 3, kind: input, shape index: {}]   ;;  %s344_s1 = inlined_call_operand.vmem [shape: bf16[8,54], index: 1, kind: input, shape index: {}]   ;;  %s345_s5 = inlined_call_operand.vmem [shape: f32[8,128], index: 5, kind: output, shape index: {}]  }
   0x1   :  { %231 = vmatprep.subr.bf16.mxu0 %v268_v0  ;;  %243 = vmatprep.subr.bf16.mxu1 %v268_v0  ;;  %v260_v1 = vld [vmem:[%s340_s0] sm:$0xff]   ;;  %v262_v3 = vld [vmem:[%s340_s0 + $0x8] sm:$0xff]   ;;  %v264_v6 = vld [vmem:[%s340_s0 + $0x10] sm:$0xff]   ;;  %vm64_vm2 = vcmask 441344  }
   0x2   :  { %v261_v2 = vld [vmem:[%s340_s0 + $0x1c] sm:$0xff]   ;;  %239 = vmatprep.mubr.msk.bf16.mxu0 %vm269_vm0, %v268_v0  ;;  %251 = vmatprep.mubr.msk.bf16.mxu1 %vm269_vm0, %v268_v0  ;;  %v263_v5 = vld [vmem:[%s340_s0 + $0x24] sm:$0xff]   ;;  %v265_v8 = vld [vmem:[%s340_s0 + $0x2c] sm:$0xff]  }
   0x3   :  { %232 = vmatpush3.bf16.msra.mxu0 %v260_v1  ;;  %258 = vset.pattern.permute.xlu0 %v270_v4  ;;  %v37_v7 = vld [vmem:[%s341_s2] sm:$0xff]  ;;  %v266_v9 = vld [vmem:[%s340_s0 + $0x18] ss:$0 sps:$4 sm:$0x77]  }
   0x4   :  { %244 = vmatpush3.bf16.msra.mxu1 %v261_v2  ;;  %233 = vmatprep.subr.bf16.mxu0 %v268_v0  ;;  %v267_v10 = vld [vmem:[%s340_s0 + $0x34] ss:$0 sps:$4 sm:$0x77]   ;;  %v122_v11 = vld [vmem:[%s342_s4] sm:$0xff]  ;;  %v70_v13 = vsel %vm68_vm1, %v266_v9, 0 }
   0x5   :  { %245 = vmatprep.subr.bf16.mxu1 %v268_v0  ;;  %259 = vset.pattern.permute.xlu1 %v270_v4  ;;  %v115_v12 = vld [vmem:[%s343_s3] sm:$0xff]  ;;  %v151_v14 = vsel %vm68_vm1, %v267_v10, 0 }
   0x6   :  { %40 = vperm.xlu0 %258, %v37_v7   ;;  %125 = vperm.xlu1 %259, %v122_v11   ;;  %v21_v15 = vld [vmem:[%s344_s1] sm:$0xf] }
   0x7   :  { %234 = vmatpush3.bf16.msra.mxu0 %v262_v3 }
   0x8   :  { %246 = vmatpush3.bf16.msra.mxu1 %v263_v5  ;;  %235 = vmatprep.subr.bf16.mxu0 %v268_v0 }
   0x9   :  { %247 = vmatprep.subr.bf16.mxu1 %v268_v0 }
   0xa   :  { %118 = vperm.xlu0 %258, %v115_v12  }
   0xb   :  { %236 = vmatpush3.bf16.msra.mxu0 %v264_v6 }
   0xc   :  { %248 = vmatpush3.bf16.msra.mxu1 %v265_v8  ;;  %237 = vmatprep.subr.bf16.mxu0 %v268_v0 }
   0xd   :  { %249 = vmatprep.subr.bf16.mxu1 %v268_v0 }
   0xf   :  { %238 = vmatpush3.bf16.msra.mxu0 %v70_v13 }
  0x10   :  { %250 = vmatpush3.bf16.msra.mxu1 %v151_v14 }
  0x12   :  { %240 = vmatmul.mubr.msk.bf16.vlgmr.msra.gmra.mrb[0].mxu0 %vm64_vm2, %v21_v15 }
  0x13   :  { %252 = vmatmul.mubr.msk.bf16.vlgmr.msra.gmra.mrb[0].mxu1 %vm64_vm2, %v21_v15 }
  0x85   :  { %v41_v16 = vpop.permute.xlu0 %40  ;;  %v126_v30 = vpop.permute.xlu1 %125 }
  0x89   :  { %v119_v29 = vpop.permute.xlu0 %118 }
  0xe5   :  { %v106_v17 = vpop.f32.mrb[0].mxu0 }
  0xe6   :  { %v107_v18 = vadd.f32 %v106_v17, %v41_v16  ;;  %v187_v19 = vpop.f32.mrb[0].mxu1  ;;  %v241_v20 = vpop.f32.mrb[1].mxu0 }
  0xe7   :  { %v188_v21 = vadd.f32 %v187_v19, %v41_v16  ;;  %v253_v22 = vpop.f32.mrb[1].mxu1  ;;  %v109_v23 = vpop.f32.mrb[2].mxu0 }
  0xe8   :  { %vm112_vm3 = vcmp.ge.f32.partialorder %v107_v18, 0.0  ;;  %v113_v24 = vmul.f32 0.01, %v107_v18  ;;  %v190_v25 = vpop.f32.mrb[2].mxu1  ;;  %v242_v26 = vpop.f32.mrb[3].mxu0 }
  0xe9   :  { %vm193_vm4 = vcmp.ge.f32.partialorder %v188_v21, 0.0  ;;  %v194_v27 = vmul.f32 0.01, %v188_v21  ;;  %v254_v28 = vpop.f32.mrb[3].mxu1 }
  0xea   :  { %v114_v31 = vsel %vm112_vm3, %v107_v18, %v113_v24 }
  0xeb   :  { %v121_v32 = vmul.f32 %v119_v29, %v114_v31  ;;  %v195_v33 = vsel %vm193_vm4, %v188_v21, %v194_v27 }
  0xec   :  { %v196_v34 = vmul.f32 %v195_v33, %v119_v29 }
  0xed   :  { %v128_v35 = vadd.f32 %v126_v30, %v121_v32 }
  0xee   :  { %v197_v36 = vadd.f32 %v196_v34, %v126_v30 }
  0xf0   :  { %v198_v37 = vmax.f32 %v128_v35, %v197_v36 }
  0xf2   :  { %199 = vst [vmem:[%s345_s5] sm:$0xff] %v198_v37 }

</bundles_post_ra>
